<compile_context>
chip_gen: v7x
topology: tpu7x:2x2x1
jax: 0.10.0
libtpu: 0.0.40
codegen_flags: <defaults>
</compile_context>

<pallas_src>
import functools

import jax
import jax.numpy as jnp
from jax.experimental import pallas as pl
from jax.experimental.pallas import tpu as pltpu


# ---------------------------------------------------------------------------
# Fused kernel: whole network in one pallas_call, z resident in VMEM scratch.
# ---------------------------------------------------------------------------
def _fused_kernel(x_ref, w1_ref, b1_ref, w2_ref, b2_ref,
                  gamma_ref, beta_ref, w3_ref, b3_ref,
                  o_ref,
                  z_scr, sum_scr, sumsq_scr,
                  *, tile_b, n_valid, inv_n):
    phase = pl.program_id(0)
    i = pl.program_id(1)
    row0 = pl.multiple_of(i * tile_b, tile_b)

    @pl.when(phase == 0)
    def _stage1():
        @pl.when(i == 0)
        def _init():
            sum_scr[...] = jnp.zeros_like(sum_scr)
            sumsq_scr[...] = jnp.zeros_like(sumsq_scr)

        # Layer 1: bf16 MXU matmul, f32 accumulate; bias + ReLU on the VPU.
        h = jnp.dot(x_ref[...], w1_ref[...], preferred_element_type=jnp.float32)
        h = jnp.maximum(h + b1_ref[...], 0.0)
        # Layer 2: cast to bf16 only at the MXU boundary.
        z = jnp.dot(h.astype(w2_ref.dtype), w2_ref[...],
                    preferred_element_type=jnp.float32) + b2_ref[...]
        z_scr[pl.ds(row0, tile_b), :] = z

        # BatchNorm partial statistics; mask out batch-padding rows.
        rows = row0 + jax.lax.broadcasted_iota(jnp.int32, z.shape, 0)
        zm = jnp.where(rows < n_valid, z, 0.0)
        sum_scr[...] += jnp.sum(zm, axis=0, keepdims=True)
        sumsq_scr[...] += jnp.sum(zm * zm, axis=0, keepdims=True)

    @pl.when(phase == 1)
    def _stage2():
        mean = sum_scr[...] * inv_n                       # (1, D) f32
        var = sumsq_scr[...] * inv_n - mean * mean        # biased variance
        inv_std = jax.lax.rsqrt(var + 1e-5)
        z = z_scr[pl.ds(row0, tile_b), :]
        r = jnp.maximum((z - mean) * inv_std * gamma_ref[...] + beta_ref[...],
                        0.0)
        out = jnp.dot(r.astype(w3_ref.dtype), w3_ref[...],
                      preferred_element_type=jnp.float32) + b3_ref[...]
        # Sigmoid: exp on the EUP, approximate reciprocal rides the EUP too.
        o_ref[...] = pl.reciprocal(1.0 + jnp.exp(-out),
                                   approx=True).astype(o_ref.dtype)


# ---------------------------------------------------------------------------
# Two-call fallback (z too large for VMEM): stage 1 emits bf16 z + per-tile
# partial BN statistics; stage 2 consumes precomputed mean / inv_std.
# ---------------------------------------------------------------------------
def _stage1_kernel(x_ref, w1_ref, b1_ref, w2_ref, b2_ref,
                   z_ref, sum_ref, sumsq_ref, *, tile_b, n_valid):
    i = pl.program_id(0)
    h = jnp.dot(x_ref[...], w1_ref[...], preferred_element_type=jnp.float32)
    h = jnp.maximum(h + b1_ref[...], 0.0)
    z = jnp.dot(h.astype(w2_ref.dtype), w2_ref[...],
                preferred_element_type=jnp.float32) + b2_ref[...]
    z_ref[...] = z.astype(z_ref.dtype)   # bf16 z -> half the HBM traffic

    rows = i * tile_b + jax.lax.broadcasted_iota(jnp.int32, z.shape, 0)
    zm = jnp.where(rows < n_valid, z, 0.0)
    s = jnp.sum(zm, axis=0, keepdims=True)        # (1, D) f32
    ss = jnp.sum(zm * zm, axis=0, keepdims=True)
    sum_ref[...] = jnp.broadcast_to(s[None], sum_ref.shape)
    sumsq_ref[...] = jnp.broadcast_to(ss[None], sumsq_ref.shape)


def _stage2_kernel(z_ref, mean_ref, inv_std_ref, gamma_ref, beta_ref,
                   w3_ref, b3_ref, o_ref):
    z = z_ref[...].astype(jnp.float32)
    r = jnp.maximum((z - mean_ref[...]) * inv_std_ref[...] * gamma_ref[...]
                    + beta_ref[...], 0.0)
    out = jnp.dot(r.astype(w3_ref.dtype), w3_ref[...],
                  preferred_element_type=jnp.float32) + b3_ref[...]
    o_ref[...] = pl.reciprocal(1.0 + jnp.exp(-out),
                               approx=True).astype(o_ref.dtype)


# ---------------------------------------------------------------------------
# Wrapper
# ---------------------------------------------------------------------------
def _round_up(n: int, m: int) -> int:
    return ((n + m - 1) // m) * m


def vanilla_nn(x, params, *, tile_b=512, fuse=True,
               max_fused_z_bytes=8 * 1024 * 1024):
    """x: [B, input_dim] float32. params: dict of f32 weights (see init_params)."""
    B, D_in = x.shape
    H = params["w1"].shape[1]
    D_out = params["w3"].shape[1]

    f32, bf16 = jnp.float32, jnp.bfloat16

    # Lane-dense feature padding: multiples of 128 (NOT 256 -- HBM-bound net).
    H_pad = _round_up(H, 128)
    D_out_pad = _round_up(D_out, 128)

    # Batch padding: multiple of 16 (bf16 sublane packing).  tile_b is clamped
    # to the largest multiple of 16 that divides B_pad, so at most 15 padding
    # rows are ever streamed.
    B_pad = _round_up(B, 16)
    tile_b = max(16, min(tile_b - tile_b % 16, B_pad))
    while B_pad % tile_b != 0:
        tile_b -= 16
    n_tiles = B_pad // tile_b

    def pad2(a, rows, cols, fill=0.0):
        r, c = a.shape
        return jnp.pad(a.astype(f32), ((0, rows - r), (0, cols - c)),
                       constant_values=fill)

    # Parameters padded once; resident in VMEM across the whole grid.  Zero
    # padding keeps padded feature columns mathematically inert (z pad == 0).
    w1 = pad2(params["w1"], D_in, H_pad).astype(bf16)
    b1 = pad2(params["b1"], 1, H_pad)
    w2 = pad2(params["w2"], H_pad, D_out_pad).astype(bf16)
    b2 = pad2(params["b2"], 1, D_out_pad)
    gamma = pad2(params["gamma"], 1, D_out_pad, fill=1.0)
    beta = pad2(params["beta"], 1, D_out_pad)
    w3 = pad2(params["w3"], D_out_pad, D_out_pad).astype(bf16)
    b3 = pad2(params["b3"], 1, D_out_pad)

    # Build x directly in bf16 (no f32-sized HBM temporary).
    x_p = jnp.pad(x.astype(bf16), ((0, B_pad - B), (0, 0)))

    # 32 MiB scoped VMEM: safe on every generation (v7x physical = 64 MiB),
    # comfortably holds the <=8 MiB fused z scratch + double-buffered tiles.
    vmem_limit = 32 * 1024 * 1024
    z_bytes = B_pad * D_out_pad * 4   # f32 z scratch in the fused path

    if fuse and z_bytes <= max_fused_z_bytes:
        # ----- Fused single kernel: z never leaves VMEM --------------------
        kernel = functools.partial(_fused_kernel, tile_b=tile_b, n_valid=B,
                                   inv_n=1.0 / B)

        def res(a):
            return pl.BlockSpec(a.shape, lambda p, i: (0, 0))

        out = pl.pallas_call(
            kernel,
            out_shape=jax.ShapeDtypeStruct((B_pad, D_out_pad), bf16),
            grid=(2, n_tiles),
            in_specs=[
                # Phase 1 re-uses tile 0 (index unchanged -> no extra DMA).
                pl.BlockSpec((tile_b, D_in), lambda p, i: (i * (1 - p), 0)),
                res(w1), res(b1), res(w2), res(b2),
                res(gamma), res(beta), res(w3), res(b3),
            ],
            # Phase 0 parks on output block 0 (never written back until the
            # first phase-1 tile overwrites it) -> monotonic block sequence.
            out_specs=pl.BlockSpec((tile_b, D_out_pad), lambda p, i: (i * p, 0)),
            scratch_shapes=[
                pltpu.VMEM((B_pad, D_out_pad), f32),   # z (persists all grid)
                pltpu.VMEM((1, D_out_pad), f32),       # per-column sum
                pltpu.VMEM((1, D_out_pad), f32),       # per-column sum of sq.
            ],
            compiler_params=pltpu.CompilerParams(
                # Both axes "arbitrary": sequential stats accumulation is
                # megacore-safe on v7x (no cross-core race on the scratch).
                dimension_semantics=("arbitrary", "arbitrary"),
                vmem_limit_bytes=vmem_limit,
            ),
        )(x_p, w1, b1, w2, b2, gamma, beta, w3, b3)

    else:
        # ----- Two-call fallback: bf16 z in HBM + per-tile BN partials -----
        def res1(a):
            return pl.BlockSpec(a.shape, lambda i: (0, 0))

        cparams = pltpu.CompilerParams(
            dimension_semantics=("parallel",),   # each tile owns its outputs
            vmem_limit_bytes=vmem_limit,
        )

        stat_shape = jax.ShapeDtypeStruct((n_tiles, 8, D_out_pad), f32)
        stat_spec = pl.BlockSpec((1, 8, D_out_pad), lambda i: (i, 0, 0))

        kernel1 = functools.partial(_stage1_kernel, tile_b=tile_b, n_valid=B)
        z, psum, psumsq = pl.pallas_call(
            kernel1,
            out_shape=(jax.ShapeDtypeStruct((B_pad, D_out_pad), bf16),
                       stat_shape, stat_shape),
            grid=(n_tiles,),
            in_specs=[
                pl.BlockSpec((tile_b, D_in), lambda i: (i, 0)),
                res1(w1), res1(b1), res1(w2), res1(b2),
            ],
            out_specs=(pl.BlockSpec((tile_b, D_out_pad), lambda i: (i, 0)),
                       stat_spec, stat_spec),
            compiler_params=cparams,
        )(x_p, w1, b1, w2, b2)

        # Tiny (n_tiles x 128) reduction in JAX -- no HBM re-read of z.
        tot = jnp.sum(psum[:, 0, :], axis=0, keepdims=True)
        totsq = jnp.sum(psumsq[:, 0, :], axis=0, keepdims=True)
        mean = tot * (1.0 / B)
        var = totsq * (1.0 / B) - mean * mean          # biased variance
        inv_std = jax.lax.rsqrt(var + 1e-5)

        out = pl.pallas_call(
            _stage2_kernel,
            out_shape=jax.ShapeDtypeStruct((B_pad, D_out_pad), bf16),
            grid=(n_tiles,),
            in_specs=[
                pl.BlockSpec((tile_b, D_out_pad), lambda i: (i, 0)),
                res1(mean), res1(inv_std), res1(gamma), res1(beta),
                res1(w3), res1(b3),
            ],
            out_specs=pl.BlockSpec((tile_b, D_out_pad), lambda i: (i, 0)),
            compiler_params=cparams,
        )(z, mean, inv_std, gamma, beta, w3, b3)

    # Tiny slice of the bf16 result; return f32 like the PyTorch module.
    return out[:B, :D_out].astype(f32)


# ---------------------------------------------------------------------------
# Parameters + pure-JAX reference
# ---------------------------------------------------------------------------
def init_params(key, input_dim, hidden_dim, output_dim):
    """Deterministic synthetic parameters (PyTorch-style uniform fan-in init)."""
    ks = jax.random.split(key, 6)

    def linear_init(kw, kb, fan_in, fan_out):
        bound = 1.0 / jnp.sqrt(fan_in)
        w = jax.random.uniform(kw, (fan_in, fan_out), jnp.float32, -bound, bound)
        b = jax.random.uniform(kb, (1, fan_out), jnp.float32, -bound, bound)
        return w, b

    w1, b1 = linear_init(ks[0], ks[1], input_dim, hidden_dim)
    w2, b2 = linear_init(ks[2], ks[3], hidden_dim, output_dim)
    w3, b3 = linear_init(ks[4], ks[5], output_dim, output_dim)
    gamma = jnp.ones((1, output_dim), jnp.float32)
    beta = jnp.zeros((1, output_dim), jnp.float32)
    return {"w1": w1, "b1": b1, "w2": w2, "b2": b2,
            "gamma": gamma, "beta": beta, "w3": w3, "b3": b3}


def vanilla_nn_ref(x, p):
    """Pure-JAX f32 reference (PyTorch forward semantics, BN in training mode)."""
    h = jnp.maximum(x @ p["w1"] + p["b1"], 0.0)
    z = h @ p["w2"] + p["b2"]
    mean = jnp.mean(z, axis=0, keepdims=True)
    var = jnp.mean((z - mean) ** 2, axis=0, keepdims=True)
    zh = (z - mean) * jax.lax.rsqrt(var + 1e-5) * p["gamma"] + p["beta"]
    r = jnp.maximum(zh, 0.0)
    out = r @ p["w3"] + p["b3"]
    return jax.nn.sigmoid(out)


# ---------------------------------------------------------------------------
if __name__ == "__main__":
    input_dim, hidden_dim, output_dim = 32, 64, 16

    key = jax.random.PRNGKey(0)
    kx1, kx2, kp = jax.random.split(key, 3)
    params = init_params(kp, input_dim, hidden_dim, output_dim)

    # 1) Small batch -> fused single-kernel path (z lives entirely in VMEM).
    x1 = jax.random.normal(kx1, (8, input_dim), jnp.float32)
    out1 = jax.block_until_ready(vanilla_nn(x1, params))
    ref1 = vanilla_nn_ref(x1, params)
    assert out1.shape == (8, output_dim)
    assert jnp.allclose(out1, ref1, atol=2e-2, rtol=2e-2), "fused mismatch"

    # 2) Odd batch, multi-tile fused path (row masking + two-phase grid).
    x2 = jax.random.normal(kx2, (37, input_dim), jnp.float32)
    out2 = jax.block_until_ready(vanilla_nn(x2, params, tile_b=16))
    ref2 = vanilla_nn_ref(x2, params)
    assert out2.shape == (37, output_dim)
    assert jnp.allclose(out2, ref2, atol=2e-2, rtol=2e-2), "fused tiled mismatch"

    # 3) Two-call fallback path (bf16 z in HBM + per-tile BN partial stats).
    out3 = jax.block_until_ready(vanilla_nn(x2, params, tile_b=16, fuse=False))
    assert out3.shape == (37, output_dim)
    assert jnp.allclose(out3, ref2, atol=2e-2, rtol=2e-2), "two-call mismatch"

    print("KERNEL_OK")
</pallas_src>

<mosaic_0001>
module attributes {stable_mosaic.version = 11 : i64} {
  func.func @_fused_kernel(%arg0: i32, %arg1: i32, %arg2: memref<16x32xbf16, #tpu.memory_space<vmem>>, %arg3: memref<32x128xbf16, #tpu.memory_space<vmem>>, %arg4: memref<1x128xf32, #tpu.memory_space<vmem>>, %arg5: memref<128x128xbf16, #tpu.memory_space<vmem>>, %arg6: memref<1x128xf32, #tpu.memory_space<vmem>>, %arg7: memref<1x128xf32, #tpu.memory_space<vmem>>, %arg8: memref<1x128xf32, #tpu.memory_space<vmem>>, %arg9: memref<128x128xbf16, #tpu.memory_space<vmem>>, %arg10: memref<1x128xf32, #tpu.memory_space<vmem>>, %arg11: memref<16x128xbf16, #tpu.memory_space<vmem>>, %arg12: memref<16x128xf32, #tpu.memory_space<vmem>>, %arg13: memref<1x128xf32, #tpu.memory_space<vmem>>, %arg14: memref<1x128xf32, #tpu.memory_space<vmem>>) attributes {dimension_semantics = [#tpu.dimension_semantics<arbitrary>, #tpu.dimension_semantics<arbitrary>], iteration_bounds = array<i64: 2, 1>, scalar_prefetch = 0 : i64, scratch_operands = 3 : i64, tpu.core_type = #tpu.core_type<tc>, window_params = [{transform_indices = @transform_0, window_bounds = array<i64: 16, 32>}, {pipeline_mode = #tpu.pipeline_mode<synchronous>, transform_indices = @transform_1, window_bounds = array<i64: 32, 128>}, {pipeline_mode = #tpu.pipeline_mode<synchronous>, transform_indices = @transform_2, window_bounds = array<i64: 1, 128>}, {pipeline_mode = #tpu.pipeline_mode<synchronous>, transform_indices = @transform_3, window_bounds = array<i64: 128, 128>}, {pipeline_mode = #tpu.pipeline_mode<synchronous>, transform_indices = @transform_4, window_bounds = array<i64: 1, 128>}, {pipeline_mode = #tpu.pipeline_mode<synchronous>, transform_indices = @transform_5, window_bounds = array<i64: 1, 128>}, {pipeline_mode = #tpu.pipeline_mode<synchronous>, transform_indices = @transform_6, window_bounds = array<i64: 1, 128>}, {pipeline_mode = #tpu.pipeline_mode<synchronous>, transform_indices = @transform_7, window_bounds = array<i64: 128, 128>}, {pipeline_mode = #tpu.pipeline_mode<synchronous>, transform_indices = @transform_8, window_bounds = array<i64: 1, 128>}, {transform_indices = @transform_9, window_bounds = array<i64: 16, 128>}]} {
    %c16_i32 = arith.constant 16 : i32
    %0 = arith.muli %arg1, %c16_i32 : i32
    %1 = tpu.assume_multiple %0, 16 : i32
    %c0_i32 = arith.constant 0 : i32
    %2 = arith.cmpi eq, %arg0, %c0_i32 : i32
    %3 = arith.extui %2 : i1 to i32
    %c0_i32_0 = arith.constant 0 : i32
    %4 = arith.cmpi ne, %3, %c0_i32_0 : i32
    scf.if %4 {
      %c0_i32_2 = arith.constant 0 : i32
      %8 = arith.cmpi eq, %arg1, %c0_i32_2 : i32
      %9 = arith.extui %8 : i1 to i32
      %c0_i32_3 = arith.constant 0 : i32
      %10 = arith.cmpi ne, %9, %c0_i32_3 : i32
      scf.if %10 {
        %cst_27 = arith.constant 0.000000e+00 : f32
        %45 = vector.broadcast %cst_27 : f32 to vector<1x128xf32>
        %c0_28 = arith.constant 0 : index
        %c0_29 = arith.constant 0 : index
        %46 = vector.load %arg13[%c0_28, %c0_29] : memref<1x128xf32, #tpu.memory_space<vmem>>, vector<1x128xf32>
        tpu.vector_store %arg13[%c0_28, %c0_29], %45 {strides = array<i32>} : memref<1x128xf32, #tpu.memory_space<vmem>>, vector<1x128xf32>,
        %cst_30 = arith.constant 0.000000e+00 : f32
        %47 = vector.broadcast %cst_30 : f32 to vector<1x128xf32>
        %c0_31 = arith.constant 0 : index
        %c0_32 = arith.constant 0 : index
        %48 = vector.load %arg14[%c0_31, %c0_32] : memref<1x128xf32, #tpu.memory_space<vmem>>, vector<1x128xf32>
        tpu.vector_store %arg14[%c0_31, %c0_32], %47 {strides = array<i32>} : memref<1x128xf32, #tpu.memory_space<vmem>>, vector<1x128xf32>,
      } else {
      }
      %c0 = arith.constant 0 : index
      %c0_4 = arith.constant 0 : index
      %11 = vector.load %arg2[%c0, %c0_4] : memref<16x32xbf16, #tpu.memory_space<vmem>>, vector<16x32xbf16>
      %c0_5 = arith.constant 0 : index
      %c0_6 = arith.constant 0 : index
      %12 = vector.load %arg3[%c0_5, %c0_6] : memref<32x128xbf16, #tpu.memory_space<vmem>>, vector<32x128xbf16>
      %cst = arith.constant dense<0.000000e+00> : vector<16x128xf32>
      %13 = tpu.matmul %11, %12, %cst {dimension_numbers = #tpu.dot_dimension_numbers<[1], [0], [0], [1], [0, 0, 1, 1], [], []>} : vector<16x32xbf16>, vector<32x128xbf16>, vector<16x128xf32> -> vector<16x128xf32>
      %c0_7 = arith.constant 0 : index
      %c0_8 = arith.constant 0 : index
      %14 = vector.load %arg4[%c0_7, %c0_8] : memref<1x128xf32, #tpu.memory_space<vmem>>, vector<1x128xf32>
      %15 = vector.broadcast %14 : vector<1x128xf32> to vector<16x128xf32>
      %16 = arith.addf %13, %15 : vector<16x128xf32>
      %cst_9 = arith.constant 0.000000e+00 : f32
      %17 = vector.broadcast %cst_9 : f32 to vector<16x128xf32>
      %18 = arith.maximumf %16, %17 : vector<16x128xf32>
      %19 = arith.truncf %18 : vector<16x128xf32> to vector<16x128xbf16>
      %c0_10 = arith.constant 0 : index
      %c0_11 = arith.constant 0 : index
      %20 = vector.load %arg5[%c0_10, %c0_11] : memref<128x128xbf16, #tpu.memory_space<vmem>>, vector<128x128xbf16>
      %cst_12 = arith.constant dense<0.000000e+00> : vector<16x128xf32>
      %21 = tpu.matmul %19, %20, %cst_12 {dimension_numbers = #tpu.dot_dimension_numbers<[1], [0], [0], [1], [0, 0, 1, 1], [], []>} : vector<16x128xbf16>, vector<128x128xbf16>, vector<16x128xf32> -> vector<16x128xf32>
      %c0_13 = arith.constant 0 : index
      %c0_14 = arith.constant 0 : index
      %22 = vector.load %arg6[%c0_13, %c0_14] : memref<1x128xf32, #tpu.memory_space<vmem>>, vector<1x128xf32>
      %23 = vector.broadcast %22 : vector<1x128xf32> to vector<16x128xf32>
      %24 = arith.addf %21, %23 : vector<16x128xf32>
      %25 = arith.index_cast %1 : i32 to index
      %c0_15 = arith.constant 0 : index
      %26 = vector.load %arg12[%25, %c0_15] : memref<16x128xf32, #tpu.memory_space<vmem>>, vector<16x128xf32>
      tpu.vector_store %arg12[%25, %c0_15], %24 {strides = array<i32>} : memref<16x128xf32, #tpu.memory_space<vmem>>, vector<16x128xf32>,
      %27 = tpu.iota {dimensions = array<i32: 0>} : vector<16x128xi32>
      %28 = vector.broadcast %1 : i32 to vector<16x128xi32>
      %29 = arith.addi %28, %27 : vector<16x128xi32>
      %c8_i32 = arith.constant 8 : i32
      %30 = vector.broadcast %c8_i32 : i32 to vector<16x128xi32>
      %31 = arith.cmpi slt, %29, %30 : vector<16x128xi32>
      %cst_16 = arith.constant 0.000000e+00 : f32
      %32 = vector.broadcast %cst_16 : f32 to vector<16x128xf32>
      %33 = arith.select %31, %24, %32 : vector<16x128xi1>, vector<16x128xf32>
      %c0_17 = arith.constant 0 : index
      %c0_18 = arith.constant 0 : index
      %34 = vector.load %arg13[%c0_17, %c0_18] : memref<1x128xf32, #tpu.memory_space<vmem>>, vector<1x128xf32>
      %cst_19 = arith.constant dense<0.000000e+00> : vector<128xf32>
      %35 = vector.multi_reduction <add>, %33, %cst_19 [0] : vector<16x128xf32> to vector<128xf32>
      %36 = vector.shape_cast %35 : vector<128xf32> to vector<1x128xf32>
      %37 = arith.addf %34, %36 : vector<1x128xf32>
      %c0_20 = arith.constant 0 : index
      %c0_21 = arith.constant 0 : index
      %38 = vector.load %arg13[%c0_20, %c0_21] : memref<1x128xf32, #tpu.memory_space<vmem>>, vector<1x128xf32>
      tpu.vector_store %arg13[%c0_20, %c0_21], %37 {strides = array<i32>} : memref<1x128xf32, #tpu.memory_space<vmem>>, vector<1x128xf32>,
      %c0_22 = arith.constant 0 : index
      %c0_23 = arith.constant 0 : index
      %39 = vector.load %arg14[%c0_22, %c0_23] : memref<1x128xf32, #tpu.memory_space<vmem>>, vector<1x128xf32>
      %40 = arith.mulf %33, %33 : vector<16x128xf32>
      %cst_24 = arith.constant dense<0.000000e+00> : vector<128xf32>
      %41 = vector.multi_reduction <add>, %40, %cst_24 [0] : vector<16x128xf32> to vector<128xf32>
      %42 = vector.shape_cast %41 : vector<128xf32> to vector<1x128xf32>
      %43 = arith.addf %39, %42 : vector<1x128xf32>
      %c0_25 = arith.constant 0 : index
      %c0_26 = arith.constant 0 : index
      %44 = vector.load %arg14[%c0_25, %c0_26] : memref<1x128xf32, #tpu.memory_space<vmem>>, vector<1x128xf32>
      tpu.vector_store %arg14[%c0_25, %c0_26], %43 {strides = array<i32>} : memref<1x128xf32, #tpu.memory_space<vmem>>, vector<1x128xf32>,
    } else {
    }
    %c1_i32 = arith.constant 1 : i32
    %5 = arith.cmpi eq, %arg0, %c1_i32 : i32
    %6 = arith.extui %5 : i1 to i32
    %c0_i32_1 = arith.constant 0 : i32
    %7 = arith.cmpi ne, %6, %c0_i32_1 : i32
    scf.if %7 {
      %c0 = arith.constant 0 : index
      %c0_2 = arith.constant 0 : index
      %8 = vector.load %arg13[%c0, %c0_2] : memref<1x128xf32, #tpu.memory_space<vmem>>, vector<1x128xf32>
      %cst = arith.constant 1.250000e-01 : f32
      %9 = vector.broadcast %cst : f32 to vector<1x128xf32>
      %10 = arith.mulf %8, %9 : vector<1x128xf32>
      %c0_3 = arith.constant 0 : index
      %c0_4 = arith.constant 0 : index
      %11 = vector.load %arg14[%c0_3, %c0_4] : memref<1x128xf32, #tpu.memory_space<vmem>>, vector<1x128xf32>
      %cst_5 = arith.constant 1.250000e-01 : f32
      %12 = vector.broadcast %cst_5 : f32 to vector<1x128xf32>
      %13 = arith.mulf %11, %12 : vector<1x128xf32>
      %14 = arith.mulf %10, %10 : vector<1x128xf32>
      %15 = arith.subf %13, %14 : vector<1x128xf32>
      %cst_6 = arith.constant 9.99999974E-6 : f32
      %16 = vector.broadcast %cst_6 : f32 to vector<1x128xf32>
      %17 = arith.addf %15, %16 : vector<1x128xf32>
      %18 = math.rsqrt %17 : vector<1x128xf32>
      %19 = arith.index_cast %1 : i32 to index
      %c0_7 = arith.constant 0 : index
      %20 = vector.load %arg12[%19, %c0_7] : memref<16x128xf32, #tpu.memory_space<vmem>>, vector<16x128xf32>
      %21 = vector.broadcast %10 : vector<1x128xf32> to vector<16x128xf32>
      %22 = arith.subf %20, %21 : vector<16x128xf32>
      %23 = vector.broadcast %18 : vector<1x128xf32> to vector<16x128xf32>
      %24 = arith.mulf %22, %23 : vector<16x128xf32>
      %c0_8 = arith.constant 0 : index
      %c0_9 = arith.constant 0 : index
      %25 = vector.load %arg7[%c0_8, %c0_9] : memref<1x128xf32, #tpu.memory_space<vmem>>, vector<1x128xf32>
      %26 = vector.broadcast %25 : vector<1x128xf32> to vector<16x128xf32>
      %27 = arith.mulf %24, %26 : vector<16x128xf32>
      %c0_10 = arith.constant 0 : index
      %c0_11 = arith.constant 0 : index
      %28 = vector.load %arg8[%c0_10, %c0_11] : memref<1x128xf32, #tpu.memory_space<vmem>>, vector<1x128xf32>
      %29 = vector.broadcast %28 : vector<1x128xf32> to vector<16x128xf32>
      %30 = arith.addf %27, %29 : vector<16x128xf32>
      %cst_12 = arith.constant 0.000000e+00 : f32
      %31 = vector.broadcast %cst_12 : f32 to vector<16x128xf32>
      %32 = arith.maximumf %30, %31 : vector<16x128xf32>
      %33 = arith.truncf %32 : vector<16x128xf32> to vector<16x128xbf16>
      %c0_13 = arith.constant 0 : index
      %c0_14 = arith.constant 0 : index
      %34 = vector.load %arg9[%c0_13, %c0_14] : memref<128x128xbf16, #tpu.memory_space<vmem>>, vector<128x128xbf16>
      %cst_15 = arith.constant dense<0.000000e+00> : vector<16x128xf32>
      %35 = tpu.matmul %33, %34, %cst_15 {dimension_numbers = #tpu.dot_dimension_numbers<[1], [0], [0], [1], [0, 0, 1, 1], [], []>} : vector<16x128xbf16>, vector<128x128xbf16>, vector<16x128xf32> -> vector<16x128xf32>
      %c0_16 = arith.constant 0 : index
      %c0_17 = arith.constant 0 : index
      %36 = vector.load %arg10[%c0_16, %c0_17] : memref<1x128xf32, #tpu.memory_space<vmem>>, vector<1x128xf32>
      %37 = vector.broadcast %36 : vector<1x128xf32> to vector<16x128xf32>
      %38 = arith.addf %35, %37 : vector<16x128xf32>
      %cst_18 = arith.constant 0.000000e+00 : f32
      %39 = vector.broadcast %cst_18 : f32 to vector<16x128xf32>
      %40 = arith.subf %39, %38 : vector<16x128xf32>
      %41 = math.exp %40 : vector<16x128xf32>
      %cst_19 = arith.constant 1.000000e+00 : f32
      %42 = vector.broadcast %cst_19 : f32 to vector<16x128xf32>
      %43 = arith.addf %42, %41 : vector<16x128xf32>
      %44 = tpu.reciprocal %43 {approx = true} : vector<16x128xf32> -> vector<16x128xf32>
      %45 = arith.truncf %44 : vector<16x128xf32> to vector<16x128xbf16>
      %c0_20 = arith.constant 0 : index
      %c0_21 = arith.constant 0 : index
      %46 = vector.load %arg11[%c0_20, %c0_21] : memref<16x128xbf16, #tpu.memory_space<vmem>>, vector<16x128xbf16>
      tpu.vector_store %arg11[%c0_20, %c0_21], %45 {strides = array<i32>} : memref<16x128xbf16, #tpu.memory_space<vmem>>, vector<16x128xbf16>,
    } else {
    }
    return
  }
  func.func @transform_0(%arg0: i32, %arg1: i32) -> (i32, i32) {
    %c1_i32 = arith.constant 1 : i32
    %0 = arith.subi %c1_i32, %arg0 : i32
    %1 = arith.muli %arg1, %0 : i32
    %c0_i32 = arith.constant 0 : i32
    %c0_i32_0 = arith.constant 0 : i32
    return %1, %c0_i32 : i32, i32
  }
  func.func @transform_1(%arg0: i32, %arg1: i32) -> (i32, i32) {
    %c0_i32 = arith.constant 0 : i32
    %c0_i32_0 = arith.constant 0 : i32
    %c0_i32_1 = arith.constant 0 : i32
    return %c0_i32, %c0_i32_0 : i32, i32
  }
  func.func @transform_2(%arg0: i32, %arg1: i32) -> (i32, i32) {
    %c0_i32 = arith.constant 0 : i32
    %c0_i32_0 = arith.constant 0 : i32
    %c0_i32_1 = arith.constant 0 : i32
    return %c0_i32, %c0_i32_0 : i32, i32
  }
  func.func @transform_3(%arg0: i32, %arg1: i32) -> (i32, i32) {
    %c0_i32 = arith.constant 0 : i32
    %c0_i32_0 = arith.constant 0 : i32
    %c0_i32_1 = arith.constant 0 : i32
    return %c0_i32, %c0_i32_0 : i32, i32
  }
  func.func @transform_4(%arg0: i32, %arg1: i32) -> (i32, i32) {
    %c0_i32 = arith.constant 0 : i32
    %c0_i32_0 = arith.constant 0 : i32
    %c0_i32_1 = arith.constant 0 : i32
    return %c0_i32, %c0_i32_0 : i32, i32
  }
  func.func @transform_5(%arg0: i32, %arg1: i32) -> (i32, i32) {
    %c0_i32 = arith.constant 0 : i32
    %c0_i32_0 = arith.constant 0 : i32
    %c0_i32_1 = arith.constant 0 : i32
    return %c0_i32, %c0_i32_0 : i32, i32
  }
  func.func @transform_6(%arg0: i32, %arg1: i32) -> (i32, i32) {
    %c0_i32 = arith.constant 0 : i32
    %c0_i32_0 = arith.constant 0 : i32
    %c0_i32_1 = arith.constant 0 : i32
    return %c0_i32, %c0_i32_0 : i32, i32
  }
  func.func @transform_7(%arg0: i32, %arg1: i32) -> (i32, i32) {
    %c0_i32 = arith.constant 0 : i32
    %c0_i32_0 = arith.constant 0 : i32
    %c0_i32_1 = arith.constant 0 : i32
    return %c0_i32, %c0_i32_0 : i32, i32
  }
  func.func @transform_8(%arg0: i32, %arg1: i32) -> (i32, i32) {
    %c0_i32 = arith.constant 0 : i32
    %c0_i32_0 = arith.constant 0 : i32
    %c0_i32_1 = arith.constant 0 : i32
    return %c0_i32, %c0_i32_0 : i32, i32
  }
  func.func @transform_9(%arg0: i32, %arg1: i32) -> (i32, i32) {
    %0 = arith.muli %arg1, %arg0 : i32
    %c0_i32 = arith.constant 0 : i32
    %c0_i32_0 = arith.constant 0 : i32
    return %0, %c0_i32 : i32, i32
  }
}

</mosaic_0001>

<bundles_post_ra>
// kernel: tpu_custom_call.1
= control target key start
LH: loop header
LB: loop body
LE: loop exit
PB: predicated region body
PF: predicated region fallthrough
CT: control target
= control target key end

     0   :  { %14 = vsyncpa [#allocation6], 0  ;;  %s1654_s0 = inlined_call_operand.hbm [shape: bf16[16,32], index: 0, kind: input, shape index: {}]   ;;  %s1655_s1 = inlined_call_operand.hbm [shape: bf16[32,128], index: 1, kind: input, shape index: {}]   ;;  %s1656_s2 = inlined_call_operand.vmem [shape: f32[1,128], index: 2, kind: input, shape index: {}]   ;;  %s1657_s3 = inlined_call_operand.hbm [shape: bf16[128,128], index: 3, kind: input, shape index: {}]   ;;  %s1658_s4 = inlined_call_operand.vmem [shape: f32[1,128], index: 4, kind: input, shape index: {}]   ;;  %s1659_s5 = inlined_call_operand.vmem [shape: f32[1,128], index: 5, kind: input, shape index: {}]   ;;  %s1660_s6 = inlined_call_operand.vmem [shape: f32[1,128], index: 6, kind: input, shape index: {}]   ;;  %s1661_s7 = inlined_call_operand.hbm [shape: bf16[128,128], index: 7, kind: input, shape index: {}]   ;;  %s1662_s8 = inlined_call_operand.vmem [shape: f32[1,128], index: 8, kind: input, shape index: {}]   ;;  %s1663_s9 = inlined_call_operand.hbm [shape: bf16[16,128], index: 9, kind: output, shape index: {}]  }
   0x1   :  { %16 = vsyncpa [#allocation6 + $0x1], 0 }
   0x2   :  { %17 = vsyncpa [#allocation9], 0 }
   0x3   :  { %18 = vsyncpa [#allocation12], 0 }
   0x4   :  { %19 = vsyncpa [#allocation7], 0 }
   0x5   :  { %21 = vsyncpa [#allocation7 + $0x1], 0  ;;  %s1449_s30 = smov 0   ;;  %s1451_s10 = smov 0  }
   0x6   :  { %s1453_s11 = smov 0  }
   0x7 LB: > { %1669 = sst [smem:[#allocation18_spill]] %s1380_s10  ;;  %s1667_s12 = sadd.s32 4294967295, %s1384_s11   ;;  %s1384_s11 = sphi %s1453_s11, %s27_s11   ;;  %s1380_s10 = sphi %s1451_s10, %s1684_s10   ;;  %s1376_s30 = sphi %s1449_s30, %s1683_s30  }
   0x8   : > { %s39_s14 = sadd.s32 1, %s1380_s10  ;;  %p972_p0 = scmp.ge.s32.totalorder %s1384_s11, 1 }
   0x9   : > { %p41_p1 = scmp.ge.s32.totalorder %s39_s14, 2  ;;  %p270_p2 = scmp.lt.s32.totalorder %s1384_s11, 3 }
   0xa   : > { %p1471_p3 = scmp.eq.s32.totalorder %s1667_s12, 0  ;;  %s1386_s17 = smov [#allocation8]  }
   0xb   : > { %s1686_s14 = smov (%p41_p1, %s39_s14), 0  ;;  %p1477_p4 = pnand %p972_p0, %p270_p2 }
   0xc   : > { %s1670_s15 = scalar_select %p1471_p3, 1, 0 }
   0xd   : > { %1671 = sst [smem:[#allocation19_spill]] %s1686_s14  ;;  %s282_s18 = sshll.u32 %s1386_s17, 4  ;;  %s283_s18 = int_to_ptr.vmem [resolvable:$true] %s282_s18 }
   0xe   : > { %s1672_s16 = scalar_select %p1477_p4, 1, 0 }
   0xf   : > { %p1112_p5 = pneg %p1477_p4  ;;  %s1387_s20 = smov [#allocation10]  }
  0x10   : > { %s298_s21 = sshll.u32 %s1387_s20, 4  ;;  %s1208_s24 = scalar_lea.hbm %s1655_s1, 256  ;;  %s299_s21 = int_to_ptr.vmem [resolvable:$true] %s298_s21 }
  0x11   : > { %p1486_p7 = pnand %p1471_p3, %p1112_p5  ;;  %p1209_p8 = scmp.ne.s32.totalorder %s1655_s1, %s1208_s24 }
  0x12   : > { %p1215_p12 = scmp.lt.u32.totalorder %s1208_s24, %s1655_s1 }
  0x13   : > { %p1498_p9 = pneg %p1486_p7 }
  0x15   : > { %p1211_p10 = pnand %p1498_p9, %p1209_p8 }
  0x17   : > { %p1212_p11 = pneg %p1211_p10 }
  0x19   : > { %p1217_p13 = pnand %p1215_p12, %p1212_p11 }
  0x1b   : > { %1220 = shalt.err (!%p1217_p13)
}
  0x1c   : > { %s1221_s17 = scalar_lea.vmem %s283_s18, 256  ;;  %p1229_p5 = scmp.lt.s32.totalorder %s283_s18, %s283_s18 }
  0x1d   : > { %p1222_p0 = scmp.ne.s32.totalorder %s283_s18, %s1221_s17  ;;  %p1230_p6 = scmp.lt.s32.totalorder %s1221_s17, %s1221_s17 }
  0x1f   : > { %p1224_p1 = pnand %p1222_p0, %p1498_p9  ;;  %p1231_p3 = por %p1230_p6, %p1229_p5 }
  0x21   : > { %p1225_p2 = pneg %p1224_p1 }
  0x23   : > { %p1232_p4 = pnand %p1231_p3, %p1225_p2 }
  0x25   : > { %1235 = shalt.err (!%p1232_p4)
}
  0x26   : > { %s1388_s20 = smov 64   ;;  %s1389_s22 = smov 4  }
  0x27   : > { %1115 = dma.hbm_to_vmem [thread:$0]  (!%p1486_p7), %s1655_s1, 256, %s283_s18, [#allocation9], %s1388_s20, %s1388_s20, %s1389_s22  }
  0x28   : > { %s1390_s25 = smov [#allocation11]   ;;  %s1236_s17 = scalar_lea.hbm %s1657_s3, 1024 }
  0x29   : > { %s320_s26 = sshll.u32 %s1390_s25, 4  ;;  %p1237_p3 = scmp.ne.s32.totalorder %s1657_s3, %s1236_s17  ;;  %s321_s26 = int_to_ptr.vmem [resolvable:$true] %s320_s26 }
  0x2a   : > { %p1243_p8 = scmp.lt.u32.totalorder %s1236_s17, %s1657_s3 }
  0x2b   : > { %p1239_p4 = pnand %p1237_p3, %p1498_p9 }
  0x2d   : > { %p1240_p6 = pneg %p1239_p4 }
  0x2f   : > { %p1245_p10 = pnand %p1243_p8, %p1240_p6 }
  0x31   : > { %1248 = shalt.err (!%p1245_p10)
}
  0x32   : > { %s1249_s18 = scalar_lea.vmem %s299_s21, 1024  ;;  %p1257_p0 = scmp.lt.s32.totalorder %s299_s21, %s299_s21 }
  0x33   : > { %p1250_p11 = scmp.ne.s32.totalorder %s299_s21, %s1249_s18  ;;  %p1258_p1 = scmp.lt.s32.totalorder %s1249_s18, %s1249_s18 }
  0x35   : > { %p1252_p12 = pnand %p1250_p11, %p1498_p9  ;;  %p1259_p2 = por %p1258_p1, %p1257_p0 }
  0x37   : > { %p1253_p13 = pneg %p1252_p12 }
  0x39   : > { %p1260_p5 = pnand %p1259_p2, %p1253_p13 }
  0x3b   : > { %1263 = shalt.err (!%p1260_p5)
}
  0x3c   : > { %1118 = dma.hbm_to_vmem [thread:$0]  (!%p1486_p7), %s1657_s3, 1024, %s299_s21, [#allocation9], %s1388_s20, %s1388_s20, %s1389_s22  }
  0x3d   : > { %s1264_s23 = scalar_lea.hbm %s1661_s7, 1024 }
  0x3e   : > { %p1265_p4 = scmp.ne.s32.totalorder %s1661_s7, %s1264_s23  ;;  %p1271_p10 = scmp.lt.u32.totalorder %s1264_s23, %s1661_s7 }
  0x40   : > { %p1267_p6 = pnand %p1265_p4, %p1498_p9 }
  0x42   : > { %p1268_p8 = pneg %p1267_p6 }
  0x44   : > { %p1273_p11 = pnand %p1271_p10, %p1268_p8 }
  0x46   : > { %1276 = shalt.err (!%p1273_p11)
}
  0x47   : > { %s1277_s21 = scalar_lea.vmem %s321_s26, 1024  ;;  %p1285_p1 = scmp.lt.s32.totalorder %s321_s26, %s321_s26 }
  0x48   : > { %p1278_p12 = scmp.ne.s32.totalorder %s321_s26, %s1277_s21  ;;  %p1286_p2 = scmp.lt.s32.totalorder %s1277_s21, %s1277_s21 }
  0x4a   : > { %p1280_p13 = pnand %p1278_p12, %p1498_p9  ;;  %p1287_p5 = por %p1286_p2, %p1285_p1 }
  0x4c   : > { %p1281_p0 = pneg %p1280_p13 }
  0x4e   : > { %p1288_p3 = pnand %p1287_p5, %p1281_p0 }
  0x50   : > { %1291 = shalt.err (!%p1288_p3)
}
  0x51   : > { %1121 = dma.hbm_to_vmem [thread:$0]  (!%p1486_p7), %s1661_s7, 1024, %s321_s26, [#allocation12], %s1388_s20, %s1388_s20, %s1389_s22  }
  0x52   : > { %p1134_p4 = scmp.eq.s32.totalorder %s1384_s11, 0  ;;  %s1391_s27 = smov [#allocation5]  }
  0x53   : > { %s350_s10 = sshll.u32 %s1391_s27, 4  ;;  %p1675_p9 = scmp.lt.s32.totalorder %s1384_s11, 2  ;;  %s351_s10 = int_to_ptr.vmem [resolvable:$true] %s350_s10 }
  0x54   : > { %s1292_s14 = scalar_lea.hbm %s1654_s0, 128 }
  0x55   : > { %p1563_p6 = pnand %p1134_p4, %p1675_p9  ;;  %p1293_p3 = scmp.ne.s32.totalorder %s1654_s0, %s1292_s14 }
  0x56   : > { %p1299_p11 = scmp.lt.u32.totalorder %s1292_s14, %s1654_s0 }
  0x57   : > { %p1294_p7 = pneg %p1563_p6 }
  0x59   : > { %p1295_p8 = pnand %p1294_p7, %p1293_p3 }
  0x5b   : > { %p1296_p10 = pneg %p1295_p8 }
  0x5d   : > { %p1301_p12 = pnand %p1299_p11, %p1296_p10 }
  0x5f   : > { %1304 = shalt.err (!%p1301_p12)
}
  0x60   : > { %s1305_s28 = scalar_lea.vmem %s351_s10, 128  ;;  %s1312_s29 = scalar_lea.vmem %s351_s10, 256 }
  0x61   : > { %p1306_p13 = scmp.ne.s32.totalorder %s351_s10, %s1305_s28  ;;  %p1313_p2 = scmp.lt.s32.totalorder %s351_s10, %s351_s10 }
  0x62   : > { %p1314_p5 = scmp.lt.s32.totalorder %s1312_s29, %s1305_s28 }
  0x63   : > { %p1308_p0 = pnand %p1306_p13, %p1294_p7 }
  0x64   : > { %p1315_p4 = por %p1314_p5, %p1313_p2 }
  0x65   : > { %p1309_p1 = pneg %p1308_p0 }
  0x67   : > { %p1316_p9 = pnand %p1315_p4, %p1309_p1 }
  0x69   : > { %1319 = shalt.err (!%p1316_p9)
}
  0x6a   : > { %1125 = dma.hbm_to_vmem [thread:$0]  (!%p1563_p6), %s1654_s0, 128, %s351_s10, [#allocation6], %s1388_s20, %s1388_s20, %s1389_s22  }
  0x6b   : > { %p1677_p3 = scmp.ne.s32.totalorder %s1672_s16, 0 }
  0x6c   : > { %p1678_p7 = scmp.ne.s32.totalorder (!%p1677_p3), %s1670_s15, 0 }
  0x6d   : > { %362 = sbr.rel (%p1677_p3) target bundleno = 889 (0x379), region = 56 }
  0x74   : > { %1359 = dma.done.wait (%p1678_p7), [#allocation6], 128  }
  0x75   : > { %1361 = vsyncadd (%p1678_p7), [#allocation6], 4294967168 }
  0x76   : > { %1363 = dma.done.wait (%p1678_p7), [#allocation9], 1280  }
  0x77   : > { %1365 = vsyncadd (%p1678_p7), [#allocation9], 4294966016 }
  0x78   : > { %1367 = dma.done.wait (%p1678_p7), [#allocation12], 1024  }
  0x79   : > { %1369 = vsyncadd (%p1678_p7), [#allocation12], 4294966272  ;;  %p983_p6 = scmp.ne.s32.totalorder %s1376_s30, 0 }
  0x7a   : > { %v1179_v0 = vld [vmem:[#allocation8] sm:$0xff] (!%p983_p6)   ;;  %v1392_v1 = vmov (!%p983_p6), 0.0   ;;  %v1180_v2 = vld [vmem:[#allocation8 + $0x8] sm:$0xff] (!%p983_p6)   ;;  %vm1393_vm0 = vmmov (!%p983_p6), 0   ;;  %v1182_v3 = vld [vmem:[#allocation10] sm:$0xff] (!%p983_p6)   ;;  %vm462_vm1 = vcmask (!%p983_p6), 261120  }
  0x7b   : > { %425 = sbr.rel (%p983_p6) target bundleno = 582 (0x246), region = 76  ;;  %1044 = vmatprep.subr.bf16.mxu0 (!%p983_p6), %v1392_v1  ;;  %430 = vst [vmem:[#allocation3] sm:$0x1] (!%p983_p6), %v1392_v1  ;;  %431 = vst [vmem:[#allocation4] sm:$0x1] (!%p983_p6), %v1392_v1  ;;  %1052 = vmatprep.subr.bf16.mxu1 (!%p983_p6), %v1392_v1  ;;  %v1181_v4 = vld [vmem:[#allocation5] sm:$0xff] (!%p983_p6)  }
  0x7c   : > { %1045 = vmatpush3.bf16.msra.mxu0 (!%p983_p6), %v1179_v0  ;;  %1048 = vmatprep.mubr.msk.bf16.mxu0 (!%p983_p6), %vm1393_vm0, %v1392_v1  ;;  %v1183_v5 = vld [vmem:[#allocation10 + $0x8] sm:$0xff] (!%p983_p6)   ;;  %v1184_v6 = vld [vmem:[#allocation10 + $0x10] sm:$0xff] (!%p983_p6)   ;;  %v1185_v7 = vld [vmem:[#allocation10 + $0x18] sm:$0xff] (!%p983_p6)  }
  0x7d   : > { %1046 = vmatprep.subr.bf16.mxu0 (!%p983_p6), %v1392_v1  ;;  %1068 = vmatprep.mubr.msk.bf16.mxu1 (!%p983_p6), %vm1393_vm0, %v1392_v1  ;;  %v1186_v8 = vld [vmem:[#allocation10 + $0x20] sm:$0xff] (!%p983_p6)   ;;  %v1187_v9 = vld [vmem:[#allocation10 + $0x28] sm:$0xff] (!%p983_p6)   ;;  %v1188_v10 = vld [vmem:[#allocation10 + $0x30] sm:$0xff] (!%p983_p6)  }
  0x7e   : > { %1053 = vmatpush3.bf16.msra.mxu1 (!%p983_p6), %v1182_v3  ;;  %v1189_v11 = vld [vmem:[#allocation10 + $0x38] sm:$0xff] (!%p983_p6)   ;;  %v984_v12 = vld [vmem:[%s1656_s2] ss:$0 sm:$0xff] (!%p983_p6) }
  0x7f   : > { %1054 = vmatprep.subr.bf16.mxu1 (!%p983_p6), %v1392_v1  ;;  %v989_v22 = vld [vmem:[%s1658_s4] ss:$0 sm:$0xff] (!%p983_p6) }
  0x80   : > { %1047 = vmatpush3.bf16.msra.mxu0 (!%p983_p6), %v1180_v2 }
  0x82   : > { %1055 = vmatpush3.bf16.msra.mxu1 %v1183_v5  ;;  %v635_v39 = vld [vmem:[#allocation3] sm:$0x1]  ;;  %v645_v42 = vld [vmem:[#allocation4] sm:$0x1] }
  0x83   : > { %1049 = vmatmul.mubr.msk.bf16.vlgmr.msra.gmra.mrb[0].mxu0 %vm462_vm1, %v1181_v4  ;;  %1056 = vmatprep.subr.bf16.mxu1 %v1392_v1 }
  0x86   : > { %1057 = vmatpush3.bf16.msra.mxu1 %v1184_v6 }
  0x87   : > { %1058 = vmatprep.subr.bf16.mxu1 %v1392_v1 }
  0x8a   : > { %1059 = vmatpush3.bf16.msra.mxu1 %v1185_v7 }
  0x8b   : > { %1060 = vmatprep.subr.bf16.mxu1 %v1392_v1 }
  0x8e   : > { %1061 = vmatpush3.bf16.msra.mxu1 %v1186_v8 }
  0x8f   : > { %1062 = vmatprep.subr.bf16.mxu1 %v1392_v1 }
  0x92   : > { %1063 = vmatpush3.bf16.msra.mxu1 %v1187_v9 }
  0x93   : > { %1064 = vmatprep.subr.bf16.mxu1 %v1392_v1 }
  0x96   : > { %1065 = vmatpush3.bf16.msra.mxu1 %v1188_v10 }
  0x97   : > { %1066 = vmatprep.subr.bf16.mxu1 %v1392_v1 }
  0x9a   : > { %1067 = vmatpush3.bf16.msra.mxu1 %v1189_v11 }
 0x156   : > { %v500_v13 = vpop.f32.mrb[0].mxu0 }
 0x157   : > { %v501_v14 = vadd.f32 %v984_v12, %v500_v13  ;;  %v1050_v15 = vpop.f32.mrb[1].mxu0 }
 0x158   : > { %v503_v16 = vpop.f32.mrb[2].mxu0 }
 0x159   : > { %v504_v17 = vadd.f32 %v984_v12, %v503_v16  ;;  %v1051_v18 = vpop.f32.mrb[3].mxu0  ;;  %v507_v19 = vmax.f32 %v501_v14, 0.0 }
 0x15b   : > { %v508_v20 = vmax.f32 %v504_v17, 0.0 }
 0x15d   : > { %v509_v21 = vpack.c.bf16 %v508_v20, %v507_v19 }
 0x15f   : > { %1069 = vmatmul.mubr.bf16.vlgmr.msra.gmra.mrb[0].mxu1 %v509_v21 }
 0x232   : > { %v615_v23 = vpop.f32.mrb[0].mxu1 }
 0x233   : > { %v616_v24 = vadd.f32 %v989_v22, %v615_v23  ;;  %v1070_v25 = vpop.f32.mrb[1].mxu1 }
 0x234   : > { %v618_v26 = vpop.f32.mrb[2].mxu1 }
 0x235   : > { %623 = vst [vmem:[#allocation2] sm:$0xff] %v616_v24  ;;  %v637_v27 = vrot.slane %v616_v24, 4  ;;  %v646_v28 = vmul.f32 %v616_v24, %v616_v24  ;;  %v619_v29 = vadd.f32 %v989_v22, %v618_v26  ;;  %v1071_v30 = vpop.f32.mrb[3].mxu1 }
 0x237   : > { %v638_v31 = vadd.f32 %v637_v27, %v616_v24  ;;  %v649_v32 = vrot.slane %v646_v28, 4  ;;  %624 = vst [vmem:[#allocation2 + $0x8] sm:$0xff] %v619_v29 }
 0x239   : > { %v639_v33 = vrot.slane %v638_v31, 2  ;;  %v650_v34 = vadd.f32 %v649_v32, %v646_v28 }
 0x23b   : > { %v640_v35 = vadd.f32 %v639_v33, %v638_v31  ;;  %v651_v36 = vrot.slane %v650_v34, 2 }
 0x23d   : > { %v641_v37 = vrot.slane %v640_v35, 1  ;;  %v652_v38 = vadd.f32 %v651_v36, %v650_v34 }
 0x23f   : > { %v642_v40 = vadd.f32 %v641_v37, %v640_v35  ;;  %v653_v41 = vrot.slane %v652_v38, 1 }
 0x241   : > { %v643_v43 = vadd.f32 %v642_v40, %v635_v39  ;;  %v654_v44 = vadd.f32 %v653_v41, %v652_v38 }
 0x243   : > { %644 = vst [vmem:[#allocation3] sm:$0x1] %v643_v43  ;;  %v655_v45 = vadd.f32 %v654_v44, %v645_v42 }
 0x245   : > { %656 = vst [vmem:[#allocation4] sm:$0x1] %v655_v45 }
 0x246 PF: > { %p998_p8 = scmp.ne.s32.totalorder %s1376_s30, 1 }
 0x247   : > { %v1190_v46 = vld [vmem:[#allocation11] sm:$0xff] (!%p998_p8)   ;;  %v1394_v47 = vmov (!%p998_p8), 0.0   ;;  %v1191_v48 = vld [vmem:[#allocation11 + $0x8] sm:$0xff] (!%p998_p8)   ;;  %vm1395_vm2 = vmmov (!%p998_p8), 0   ;;  %v1192_v49 = vld [vmem:[#allocation11 + $0x10] sm:$0xff] (!%p998_p8)   ;;  %v673_v55 = vlaneseq (!%p998_p8) }
 0x248   : > { %660 = sbr.rel (%p998_p8) target bundleno = 865 (0x361), region = 84  ;;  %1072 = vmatprep.subr.bf16.mxu0 (!%p998_p8), %v1394_v47  ;;  %1088 = vmatprep.mubr.msk.bf16.mxu0 (!%p998_p8), %vm1395_vm2, %v1394_v47  ;;  %v1193_v54 = vld [vmem:[#allocation11 + $0x18] sm:$0xff] (!%p998_p8)   ;;  %v1194_v58 = vld [vmem:[#allocation11 + $0x20] sm:$0xff] (!%p998_p8)   ;;  %v1195_v61 = vld [vmem:[#allocation11 + $0x28] sm:$0xff] (!%p998_p8)  }
 0x249   : > { %1073 = vmatpush3.bf16.msra.mxu0 (!%p998_p8), %v1190_v46  ;;  %v674_v59 = vshrl.u32 (!%p998_p8), %v673_v55, 7  ;;  %v1196_v63 = vld [vmem:[#allocation11 + $0x30] sm:$0xff] (!%p998_p8)   ;;  %v1197_v3 = vld [vmem:[#allocation11 + $0x38] sm:$0xff] (!%p998_p8)   ;;  %v999_v8 = vld [vmem:[%s1659_s5] ss:$0 sm:$0xff] (!%p998_p8) }
 0x24a   : > { %1074 = vmatprep.subr.bf16.mxu0 (!%p998_p8), %v1394_v47  ;;  %v661_v50 = vld [vmem:[#allocation3] sm:$0x1] (!%p998_p8)  ;;  %v670_v1 = vld [vmem:[#allocation2] sm:$0xff] (!%p998_p8)  ;;  %v671_v2 = vld [vmem:[#allocation2 + $0x8] sm:$0xff] (!%p998_p8) }
 0x24b   : > { %v662_v52 = vmul.f32 (!%p998_p8), 0.125, %v661_v50  ;;  %v675_v62 = vsub.s32 (!%p998_p8), 0, %v674_v59  ;;  %v1000_v11 = vld [vmem:[%s1660_s6] ss:$0 sm:$0xff] (!%p998_p8) }
 0x24c   : > { %v663_v51 = vld [vmem:[#allocation4] sm:$0x1] (!%p998_p8)  ;;  %v1001_v19 = vld [vmem:[%s1662_s8] ss:$0 sm:$0xff] (!%p998_p8) }
 0x24d   : > { %1075 = vmatpush3.bf16.msra.mxu0 (!%p998_p8), %v1191_v48  ;;  %v664_v53 = vmul.f32 (!%p998_p8), 0.125, %v663_v51  ;;  %v665_v56 = vmul.f32 (!%p998_p8), %v662_v52, %v662_v52  ;;  %v676_v0 = vrot.slane (!%p998_p8), %v662_v52, %v675_v62 }
 0x24e   : > { %1076 = vmatprep.subr.bf16.mxu0 (!%p998_p8), %v1394_v47 }
 0x24f   : > { %v666_v57 = vsub.f32 %v664_v53, %v665_v56  ;;  %v678_v4 = vsub.f32 %v670_v1, %v676_v0  ;;  %v679_v5 = vsub.f32 %v671_v2, %v676_v0 }
 0x251   : > { %1077 = vmatpush3.bf16.msra.mxu0 %v1192_v49  ;;  %v667_v60 = vadd.f32 1e-05, %v666_v57 }
 0x252   : > { %1078 = vmatprep.subr.bf16.mxu0 %v1394_v47 }
 0x253   : > { %1198 = vrsqrt.f32 %v667_v60 }
 0x255   : > { %1079 = vmatpush3.bf16.msra.mxu0 %v1193_v54 }
 0x256   : > { %1080 = vmatprep.subr.bf16.mxu0 %v1394_v47 }
 0x259   : > { %1081 = vmatpush3.bf16.msra.mxu0 %v1194_v58 }
 0x25a   : > { %1082 = vmatprep.subr.bf16.mxu0 %v1394_v47 }
 0x25d   : > { %1083 = vmatpush3.bf16.msra.mxu0 %v1195_v61  ;;  %v1199_v6 = vpop.eup %1198 }
 0x25e   : > { %1084 = vmatprep.subr.bf16.mxu0 %v1394_v47  ;;  %v684_v7 = vrot.slane %v1199_v6, %v675_v62 }
 0x260   : > { %v686_v9 = vmul.f32 %v684_v7, %v678_v4  ;;  %v687_v10 = vmul.f32 %v684_v7, %v679_v5 }
 0x261   : > { %1085 = vmatpush3.bf16.msra.mxu0 %v1196_v63 }
 0x262   : > { %1086 = vmatprep.subr.bf16.mxu0 %v1394_v47  ;;  %v695_v12 = vmul.f32 %v999_v8, %v686_v9  ;;  %v696_v13 = vmul.f32 %v999_v8, %v687_v10 }
 0x264   : > { %v704_v14 = vadd.f32 %v1000_v11, %v695_v12  ;;  %v705_v15 = vadd.f32 %v1000_v11, %v696_v13 }
 0x265   : > { %1087 = vmatpush3.bf16.msra.mxu0 %v1197_v3 }
 0x266   : > { %v706_v16 = vmax.f32 %v704_v14, 0.0  ;;  %v707_v17 = vmax.f32 %v705_v15, 0.0 }
 0x268   : > { %v708_v18 = vpack.c.bf16 %v707_v17, %v706_v16 }
 0x26a   : > { %1089 = vmatmul.mubr.bf16.vlgmr.msra.gmra.mrb[0].mxu0 %v708_v18 }
 0x33d   : > { %v814_v20 = vpop.f32.mrb[0].mxu0 }
 0x33e   : > { %v815_v21 = vadd.f32 %v1001_v19, %v814_v20  ;;  %v1090_v22 = vpop.f32.mrb[1].mxu0 }
 0x33f   : > { %v817_v23 = vpop.f32.mrb[2].mxu0 }
 0x340   : > { %v821_v24 = vsub.f32 0.0, %v815_v21  ;;  %v818_v25 = vadd.f32 %v1001_v19, %v817_v23  ;;  %v1091_v26 = vpop.f32.mrb[3].mxu0 }
 0x342   : > { %v823_v27 = vmul.f32 1.442695, %v821_v24  ;;  %v822_v28 = vsub.f32 0.0, %v818_v25 }
 0x344   : > { %1200 = vpow2.f32 %v823_v27  ;;  %v825_v29 = vmul.f32 1.442695, %v822_v28 }
 0x346   : > { %1202 = vpow2.f32 %v825_v29 }
 0x34e   : > { %v1201_v30 = vpop.eup %1200 }
 0x34f   : > { %v827_v31 = vadd.f32 1.0, %v1201_v30 }
 0x350   : > { %v1203_v32 = vpop.eup %1202 }
 0x351   : > { %v828_v33 = vadd.f32 1.0, %v1203_v32  ;;  %1204 = vrcp.f32 %v827_v31 }
 0x353   : > { %1206 = vrcp.f32 %v828_v33 }
 0x35b   : > { %v1205_v34 = vpop.eup %1204 }
 0x35d   : > { %v1207_v35 = vpop.eup %1206 }
 0x35e   : > { %v1021_v36 = vpack.c.bf16 %v1207_v35, %v1205_v34 }
 0x360   : > { %1022 = vst [vmem:[#allocation13] sm:$0xff] %v1021_v36  }
 0x361 PF: > { %s1679_s19 = sadd.s32 4294967295, %s1384_s11   ;;  %s1396_s23 = smov [#allocation13]  }
 0x362   : > { %p1619_p10 = scmp.eq.s32.totalorder %s1679_s19, 1  ;;  %s856_s24 = sshll.u32 %s1396_s23, 4  ;;  %s857_s24 = int_to_ptr.vmem [resolvable:$true] %s856_s24 }
 0x363   : > { %s1320_s26 = scalar_lea.vmem %s857_s24, 128  ;;  %s1326_s25 = scalar_lea.vmem %s857_s24, 256 }
 0x364   : > { %p1321_p11 = scmp.ne.s32.totalorder %s857_s24, %s1320_s26  ;;  %p1327_p0 = scmp.lt.s32.totalorder %s857_s24, %s857_s24 }
 0x365   : > { %p1328_p1 = scmp.lt.s32.totalorder %s1326_s25, %s1320_s26 }
 0x366   : > { %p1322_p12 = pnand %p1321_p11, %p1619_p10 }
 0x367   : > { %p1329_p2 = por %p1328_p1, %p1327_p0 }
 0x368   : > { %p1323_p13 = pneg %p1322_p12 }
 0x36a   : > { %p1330_p5 = pnand %p1329_p2, %p1323_p13 }
 0x36c   : > { %1333 = shalt.err (!%p1330_p5)
}
 0x36d   : > { %s1334_s21 = scalar_lea.hbm %s1663_s9, 128 }
 0x36e   : > { %p1335_p4 = scmp.ne.s32.totalorder %s1663_s9, %s1334_s21  ;;  %p1340_p7 = scmp.lt.u32.totalorder %s1334_s21, %s1663_s9 }
 0x370   : > { %p1336_p9 = pnand %p1335_p4, %p1619_p10 }
 0x372   : > { %p1337_p3 = pneg %p1336_p9 }
 0x374   : > { %p1342_p6 = pnand %p1340_p7, %p1337_p3 }
 0x376   : > { %1345 = shalt.err (!%p1342_p6)
}
 0x377   : > { %s1397_s22 = smov 64   ;;  %s1398_s30 = smov 4  }
 0x378   : > { %1109 = dma.vmem_to_hbm [thread:$0]  (%p1619_p10), %s857_s24, 128, %s1663_s9, [#allocation7], %s1397_s22, %s1397_s22, %s1398_s30  }
 0x379 PF: > { %s1681_s10 = sadd.s32 4294967294, %s1384_s11   ;;  %p1682_p11 = scmp.ge.s32.totalorder %s1384_s11, 2 }
 0x37a   : > { %p1141_p8 = scmp.eq.s32.totalorder %s1681_s10, 1 }
 0x37c   : > { %p1127_p12 = pnand %p1141_p8, %p1682_p11 }
 0x37e   : > { %1371 = dma.done.wait (!%p1127_p12), [#allocation7], 128  }
 0x37f   : > { %1373 = vsyncadd (!%p1127_p12), [#allocation7], 4294967168  ;;  %s27_s11 = sadd.s32 1, %s1384_s11   ;;  %s1683_s30 = sld [smem:[#allocation18_spill]] }
 0x380   : > { %p24_p13 = scmp.ge.s32.totalorder %s27_s11, 4   ;;  %s1684_s10 = sld [smem:[#allocation19_spill]] }
 0x382   :  { %26 = sbr.rel (!%p24_p13) target bundleno = 7 (0x7), region = 127 }
 0x389   :  { %877 = vsyncpa [#allocation6], 1 }
 0x38a   :  { %879 = vsyncpa [#allocation6 + $0x1], 1 }
 0x38b   :  { %880 = vsyncpa [#allocation9], 1 }
 0x38c   :  { %881 = vsyncpa [#allocation12], 1 }
 0x38d   :  { %882 = vsyncpa [#allocation7], 1 }
 0x38e   :  { %884 = vsyncpa [#allocation7 + $0x1], 1 }

</bundles_post_ra>
